<compile_context>
chip_gen: v5e
topology: v5e:2x2
jax: 0.10.0
libtpu: 0.0.40
codegen_flags: <defaults>
</compile_context>

<pallas_src>
import functools

import jax
import jax.numpy as jnp
import numpy as np
from jax.experimental import pallas as pl
from jax.experimental.pallas import tpu as pltpu

# Finite "-inf" for masked (padded) classes.  MUST be a Python float: a jnp
# scalar here is captured as a kernel constant and breaks tracing.
_NEG = -1e30


def _round_up(x, m):
    return (x + m - 1) // m * m


def _log_softmax(x):
    m = jnp.max(x, axis=1, keepdims=True)
    s = x - m
    return s - jnp.log(jnp.sum(jnp.exp(s), axis=1, keepdims=True))


def _pick_batch_tile(B, max_tb=256):
    for tb in range(min(B, max_tb), 0, -1):
        if B % tb == 0 and (tb % 16 == 0 or tb == B):
            return tb
    return B


def _pick_k_tile(Kp, max_tk=2048):
    n128 = Kp // 128
    for m in range(min(n128, max(max_tk // 128, 1)), 0, -1):
        if n128 % m == 0:
            return m * 128
    return 128


def _vmem_limit_bytes():
    # v5e default scoped VMEM is 16 MiB (of 128), v6e 32 (of 128), v7x 32 (of 64);
    # raise it explicitly, leaving headroom for compiler-internal scratch.
    try:
        cap = int(pltpu.get_tpu_info().vmem_capacity_bytes)
    except Exception:
        cap = 64 * 1024 * 1024
    return min(cap * 3 // 4, 112 * 1024 * 1024)


# --------------------- teacher weight prep (done ONCE) ---------------------- #
def prepare_teacher_params(w, b):
    """Pad/cast the linear-teacher params once, outside the training step.

    w: (K, C) f32, b: (C,) f32  ->  (Kp128, Cpad) bf16, (1, Cpad) f32.
    """
    K, C = w.shape
    Kp, Cp = _round_up(K, 128), _round_up(C, 128)
    w_p = jnp.pad(w, ((0, Kp - K), (0, Cp - C))).astype(jnp.bfloat16)
    b_p = jnp.pad(b.astype(jnp.float32), ((0, Cp - C),)).reshape(1, Cp)
    return jax.lax.stop_gradient(w_p), jax.lax.stop_gradient(b_p)


# ------------------------ fused teacher-matmul + loss ----------------------- #
def _fused_distill_kernel(labels_ref, student_ref, kd_ref, x_ref, w_ref, b_ref,
                          o_ref, acc_ref, base_ref, *, tau, C, mode):
    """Grid = (batch tiles [parallel], K tiles [arbitrary reduction]).

    Output row (1,1,128): lane 0 = base-CE partial sum, lane 1 = distillation
    partial sum (raw sums; normalization / alpha / tau**2 in the wrapper).
    """
    k = pl.program_id(1)
    nk = pl.num_programs(1)

    @pl.when(k == 0)
    def _():
        acc_ref[...] = jnp.zeros_like(acc_ref)
        # Student-only CE does not depend on the teacher matmul: compute it up
        # front so it overlaps the K-loop DMA/MXU pipeline (perf review).
        tb, Cpad = student_ref.shape
        classes = jax.lax.broadcasted_iota(jnp.int32, (tb, Cpad), 1)
        student = jnp.where(classes < C, student_ref[...].astype(jnp.float32), _NEG)
        onehot = (classes == labels_ref[...]).astype(jnp.float32)
        base = -jnp.sum(onehot * _log_softmax(student))
        base_ref[...] = base * jnp.ones((1, 1), jnp.float32)

    # Teacher-logit partial: (tb, tk) @ (tk, Cpad), bf16 operands, f32 accumulate.
    acc_ref[...] += jnp.dot(x_ref[...], w_ref[...],
                            preferred_element_type=jnp.float32)

    @pl.when(k == nk - 1)
    def _():
        tb, Cpad = acc_ref.shape
        classes = jax.lax.broadcasted_iota(jnp.int32, (tb, Cpad), 1)
        valid = classes < C
        teacher = jnp.where(valid, acc_ref[...] + b_ref[...], _NEG)
        kd = jnp.where(valid, kd_ref[...].astype(jnp.float32), _NEG)

        if mode == "soft":
            # kl_div(log_softmax(kd/T), log_softmax(teacher/T), 'sum', log_target=True)
            inv_tau = 1.0 / tau
            s_log = _log_softmax(kd * inv_tau)
            t_log = _log_softmax(teacher * inv_tau)
            p_t = jnp.exp(t_log)          # exact teacher softmax (no approx recip bias)
            distill = jnp.sum(p_t * (t_log - s_log))
        else:  # "hard": cross_entropy(outputs_kd, teacher.argmax(dim=1))
            t_max = jnp.max(teacher, axis=1, keepdims=True)
            is_max = jnp.logical_and(teacher == t_max, valid)
            arg = jnp.min(jnp.where(is_max, classes, Cpad), axis=1, keepdims=True)
            t_onehot = (classes == arg).astype(jnp.float32)
            distill = -jnp.sum(t_onehot * _log_softmax(kd))

        lanes = jax.lax.broadcasted_iota(jnp.int32, (1, 1, 128), 2)
        base_val = base_ref[...].reshape(1, 1, 1)
        o_ref[...] = (jnp.where(lanes == 0, base_val, 0.0)
                      + jnp.where(lanes == 1, distill, 0.0))


def _run_fused_kernel(labels2d, student, kd, x, w, b, *, tau, C, mode, tb, tk):
    B, Cpad = student.shape
    Kp = x.shape[1]
    nb, nk = B // tb, Kp // tk
    kernel = functools.partial(_fused_distill_kernel,
                               tau=float(tau), C=int(C), mode=mode)
    cost = pl.CostEstimate(
        flops=2 * B * Kp * Cpad + 40 * B * Cpad,
        transcendentals=4 * B * Cpad,
        bytes_accessed=(x.size + w.size) * 2
        + (student.size + kd.size + b.size + labels2d.size) * 4
        + nb * 128 * 4,
    )
    return pl.pallas_call(
        kernel,
        out_shape=jax.ShapeDtypeStruct((nb, 1, 128), jnp.float32),
        grid_spec=pltpu.PrefetchScalarGridSpec(
            num_scalar_prefetch=0,
            grid=(nb, nk),
            in_specs=[
                pl.BlockSpec((tb, 1), lambda bi, ki: (bi, 0)),       # labels
                pl.BlockSpec((tb, Cpad), lambda bi, ki: (bi, 0)),    # student logits
                pl.BlockSpec((tb, Cpad), lambda bi, ki: (bi, 0)),    # student kd logits
                pl.BlockSpec((tb, tk), lambda bi, ki: (bi, ki)),     # x tile (bf16)
                pl.BlockSpec((tk, Cpad), lambda bi, ki: (ki, 0)),    # teacher W tile (bf16)
                pl.BlockSpec((1, Cpad), lambda bi, ki: (0, 0)),      # teacher bias
            ],
            out_specs=pl.BlockSpec((1, 1, 128), lambda bi, ki: (bi, 0, 0)),
            scratch_shapes=[pltpu.VMEM((tb, Cpad), jnp.float32),     # teacher-logit acc
                            pltpu.VMEM((1, 1), jnp.float32)],        # base-CE partial
        ),
        compiler_params=pltpu.CompilerParams(
            dimension_semantics=("parallel", "arbitrary"),
            vmem_limit_bytes=_vmem_limit_bytes()),
        cost_estimate=cost,
    )(labels2d, student, kd, x, w, b)


# --------------------------- CE-only ('none') path -------------------------- #
def _ce_only_kernel(labels_ref, student_ref, o_ref, *, C):
    tb, Cpad = student_ref.shape
    classes = jax.lax.broadcasted_iota(jnp.int32, (tb, Cpad), 1)
    student = jnp.where(classes < C, student_ref[...].astype(jnp.float32), _NEG)
    onehot = (classes == labels_ref[...]).astype(jnp.float32)
    ce_sum = -jnp.sum(onehot * _log_softmax(student))
    lanes = jax.lax.broadcasted_iota(jnp.int32, (1, 1, 128), 2)
    o_ref[...] = jnp.where(lanes == 0, ce_sum, 0.0)


def _run_ce_kernel(labels2d, student, *, C, tb):
    B, Cpad = student.shape
    nb = B // tb
    return pl.pallas_call(
        functools.partial(_ce_only_kernel, C=int(C)),
        out_shape=jax.ShapeDtypeStruct((nb, 1, 128), jnp.float32),
        grid_spec=pltpu.PrefetchScalarGridSpec(
            num_scalar_prefetch=0,
            grid=(nb,),
            in_specs=[pl.BlockSpec((tb, 1), lambda bi: (bi, 0)),
                      pl.BlockSpec((tb, Cpad), lambda bi: (bi, 0))],
            out_specs=pl.BlockSpec((1, 1, 128), lambda bi: (bi, 0, 0)),
        ),
        compiler_params=pltpu.CompilerParams(
            dimension_semantics=("parallel",),
            vmem_limit_bytes=_vmem_limit_bytes()),
    )(labels2d, student)


# ------------------------------ module wrapper ------------------------------ #
def distillation_loss(outputs, labels, inputs=None, *, teacher_params=None,
                      distillation_type="soft", alpha=0.5, tau=1.0,
                      max_tk=2048, max_tb=256):
    """JAX/Pallas equivalent of DistillationLoss.forward.

    teacher_params must come from prepare_teacher_params() (pre-padded bf16 W,
    f32 bias) so no per-call pad/cast pass over the teacher weights happens.
    """
    assert distillation_type in ("none", "soft", "hard")
    outputs_kd = None
    extra_losses = None
    if isinstance(outputs, (tuple, list)):
        if len(outputs) == 2:
            outputs, outputs_kd = outputs
        elif len(outputs) == 3:
            outputs, outputs_kd, extra_losses = outputs
        else:
            raise ValueError(
                "model output must be (logits,) / (logits, kd) / (logits, kd, extra)")

    B, C = outputs.shape
    Cpad = _round_up(C, 128)
    pad_c = Cpad - C
    tb = _pick_batch_tile(B, max_tb)

    labels2d = labels.astype(jnp.int32).reshape(B, 1)
    # Student/kd logits stay f32 (base-criterion fidelity); at realistic B*C
    # they could be streamed as bf16 per the perf review.
    student_p = outputs.astype(jnp.float32)
    if pad_c:
        student_p = jnp.pad(student_p, ((0, 0), (0, pad_c)))

    if distillation_type == "none":
        part = _run_ce_kernel(labels2d, student_p, C=C, tb=tb)
        loss = jnp.sum(part[:, 0, 0]) / B
    else:
        if outputs_kd is None:
            raise ValueError("distillation enabled: model must return (logits, logits_kd)")
        w_p, b_p = teacher_params
        Kp, Cpad_w = w_p.shape
        assert Cpad_w == Cpad, "teacher_params prepared for a different class count"

        K = int(np.prod(inputs.shape[1:]))
        assert Kp >= K and Kp == _round_up(K, 128)
        # Teacher runs under torch.no_grad() in the reference -> stop_gradient.
        # x is padded only to the 128-multiple K the weights were prepared with.
        x_flat = inputs.reshape(B, K).astype(jnp.bfloat16)
        if Kp != K:
            x_flat = jnp.pad(x_flat, ((0, 0), (0, Kp - K)))
        x_flat = jax.lax.stop_gradient(x_flat)

        kd_p = outputs_kd.astype(jnp.float32)
        if pad_c:
            kd_p = jnp.pad(kd_p, ((0, 0), (0, pad_c)))

        tk = _pick_k_tile(Kp, max_tk)
        part = _run_fused_kernel(labels2d, student_p, kd_p, x_flat, w_p, b_p,
                                 tau=tau, C=C, mode=distillation_type,
                                 tb=tb, tk=tk)
        base = jnp.sum(part[:, 0, 0]) / B
        if distillation_type == "soft":
            distill = jnp.sum(part[:, 0, 1]) * (tau * tau) / (B * C)
        else:
            distill = jnp.sum(part[:, 0, 1]) / B
        loss = base * (1.0 - alpha) + distill * alpha

    if extra_losses is not None:
        if "loss_sym" in extra_losses:
            loss = loss + 0.1 * jnp.mean(extra_losses["loss_sym"])
        if "loss_exp" in extra_losses:
            loss = loss + 0.2 * jnp.mean(extra_losses["loss_exp"])
        if "loss_sem_sym" in extra_losses:
            loss = loss + 0.2 * jnp.mean(extra_losses["loss_sem_sym"])
    return loss


# ---------------------------------- main ----------------------------------- #
if __name__ == "__main__":
    key = jax.random.PRNGKey(0)
    k1, k2, k3, k4, k5, k6, k7, k8 = jax.random.split(key, 8)

    B, Cimg, H, W = 8, 4, 16, 16
    num_classes = 16
    K = Cimg * H * W
    alpha, tau = 0.5, 2.0

    inputs = jax.random.normal(k1, (B, Cimg, H, W), jnp.float32)          # NCHW
    student_logits = jax.random.normal(k2, (B, num_classes), jnp.float32)
    student_logits_kd = jax.random.normal(k3, (B, num_classes), jnp.float32)
    labels = jax.random.randint(k4, (B,), 0, num_classes, jnp.int32)
    teacher_w = jax.random.normal(k5, (K, num_classes), jnp.float32) * 0.02
    teacher_b = jax.random.normal(k6, (num_classes,), jnp.float32) * 0.01
    extra = {"loss_sym": jax.random.normal(k7, (B,), jnp.float32) ** 2,
             "loss_exp": jax.random.normal(k8, (B,), jnp.float32) ** 2}

    # Pre-pad + pre-cast teacher weights ONCE (perf review item #1).
    teacher_prepped = prepare_teacher_params(teacher_w, teacher_b)

    # max_tk=512 only to exercise the multi-step K reduction at this toy K;
    # at realistic K leave the default 2048 (v7x-safe, larger on v5e/v6e).
    loss_soft = jax.block_until_ready(distillation_loss(
        (student_logits, student_logits_kd, extra), labels, inputs,
        teacher_params=teacher_prepped, distillation_type="soft",
        alpha=alpha, tau=tau, max_tk=512))
    loss_hard = jax.block_until_ready(distillation_loss(
        (student_logits, student_logits_kd), labels, inputs,
        teacher_params=teacher_prepped, distillation_type="hard",
        alpha=alpha, tau=tau, max_tk=512))
    loss_none = jax.block_until_ready(distillation_loss(
        (student_logits, student_logits_kd), labels, inputs,
        teacher_params=teacher_prepped, distillation_type="none",
        alpha=alpha, tau=tau))

    # ----- pure-JAX references (teacher matmul in bf16, matching the kernel) ----
    x_bf = inputs.reshape(B, -1).astype(jnp.bfloat16)
    w_bf = teacher_w.astype(jnp.bfloat16)
    t_logits = jnp.dot(x_bf, w_bf, preferred_element_type=jnp.float32) + teacher_b

    base = -jnp.mean(jnp.take_along_axis(_log_softmax(student_logits),
                                         labels[:, None], axis=1))
    s_log = _log_softmax(student_logits_kd / tau)
    t_log = _log_softmax(t_logits / tau)
    kl = jnp.sum(jnp.exp(t_log) * (t_log - s_log)) * (tau * tau) / (B * num_classes)
    ref_soft = (base * (1.0 - alpha) + kl * alpha
                + 0.1 * jnp.mean(extra["loss_sym"])
                + 0.2 * jnp.mean(extra["loss_exp"]))
    hard_t = jnp.argmax(t_logits, axis=1)
    hard_ce = -jnp.mean(jnp.take_along_axis(_log_softmax(student_logits_kd),
                                            hard_t[:, None], axis=1))
    ref_hard = base * (1.0 - alpha) + hard_ce * alpha
    ref_none = base

    assert np.allclose(np.asarray(loss_soft), np.asarray(ref_soft),
                       rtol=5e-3, atol=5e-3), (loss_soft, ref_soft)
    assert np.allclose(np.asarray(loss_hard), np.asarray(ref_hard),
                       rtol=5e-3, atol=5e-3), (loss_hard, ref_hard)
    assert np.allclose(np.asarray(loss_none), np.asarray(ref_none),
                       rtol=5e-3, atol=5e-3), (loss_none, ref_none)
    print("KERNEL_OK")
</pallas_src>

<mosaic_0001>
module attributes {stable_mosaic.version = 11 : i64} {
  func.func @_fused_distill_kernel(%arg0: i32, %arg1: i32, %arg2: memref<8x1xi32, #tpu.memory_space<vmem>>, %arg3: memref<8x128xf32, #tpu.memory_space<vmem>>, %arg4: memref<8x128xf32, #tpu.memory_space<vmem>>, %arg5: memref<8x512xbf16, #tpu.memory_space<vmem>>, %arg6: memref<512x128xbf16, #tpu.memory_space<vmem>>, %arg7: memref<1x128xf32, #tpu.memory_space<vmem>>, %arg8: memref<1x1x128xf32, #tpu.memory_space<vmem>>, %arg9: memref<8x128xf32, #tpu.memory_space<vmem>>, %arg10: memref<1x1xf32, #tpu.memory_space<vmem>>) attributes {dimension_semantics = [#tpu.dimension_semantics<parallel>, #tpu.dimension_semantics<arbitrary>], iteration_bounds = array<i64: 1, 2>, scalar_prefetch = 0 : i64, scratch_operands = 2 : i64, tpu.core_type = #tpu.core_type<tc>, window_params = [{transform_indices = @transform_0, window_bounds = array<i64: 8, 1>}, {transform_indices = @transform_1, window_bounds = array<i64: 8, 128>}, {transform_indices = @transform_2, window_bounds = array<i64: 8, 128>}, {transform_indices = @transform_3, window_bounds = array<i64: 8, 512>}, {transform_indices = @transform_4, window_bounds = array<i64: 512, 128>}, {pipeline_mode = #tpu.pipeline_mode<synchronous>, transform_indices = @transform_5, window_bounds = array<i64: 1, 128>}, {transform_indices = @transform_6, window_bounds = array<i64: 1, 1, 128>}]} {
    %c0_i32 = arith.constant 0 : i32
    %0 = arith.cmpi eq, %arg1, %c0_i32 : i32
    %1 = arith.extui %0 : i1 to i32
    %c0_i32_0 = arith.constant 0 : i32
    %2 = arith.cmpi ne, %1, %c0_i32_0 : i32
    scf.if %2 {
      %cst_9 = arith.constant 0.000000e+00 : f32
      %12 = vector.broadcast %cst_9 : f32 to vector<8x128xf32>
      %c0_10 = arith.constant 0 : index
      %c0_11 = arith.constant 0 : index
      %13 = vector.load %arg9[%c0_10, %c0_11] : memref<8x128xf32, #tpu.memory_space<vmem>>, vector<8x128xf32>
      tpu.vector_store %arg9[%c0_10, %c0_11], %12 {strides = array<i32>} : memref<8x128xf32, #tpu.memory_space<vmem>>, vector<8x128xf32>,
      %14 = tpu.iota {dimensions = array<i32: 1>} : vector<8x128xi32>
      %c16_i32 = arith.constant 16 : i32
      %15 = vector.broadcast %c16_i32 : i32 to vector<8x128xi32>
      %16 = arith.cmpi slt, %14, %15 : vector<8x128xi32>
      %c0_12 = arith.constant 0 : index
      %c0_13 = arith.constant 0 : index
      %17 = vector.load %arg3[%c0_12, %c0_13] : memref<8x128xf32, #tpu.memory_space<vmem>>, vector<8x128xf32>
      %cst_14 = arith.constant -1.000000e+30 : f32
      %18 = vector.broadcast %cst_14 : f32 to vector<8x128xf32>
      %19 = arith.select %16, %17, %18 : vector<8x128xi1>, vector<8x128xf32>
      %c0_15 = arith.constant 0 : index
      %c0_16 = arith.constant 0 : index
      %20 = vector.load %arg2[%c0_15, %c0_16] : memref<8x1xi32, #tpu.memory_space<vmem>>, vector<8x1xi32>
      %21 = vector.broadcast %20 : vector<8x1xi32> to vector<8x128xi32>
      %22 = arith.cmpi eq, %14, %21 : vector<8x128xi32>
      %23 = arith.extui %22 : vector<8x128xi1> to vector<8x128xi32>
      %24 = arith.sitofp %23 : vector<8x128xi32> to vector<8x128xf32>
      %cst_17 = arith.constant dense<0xFF800000> : vector<8xf32>
      %25 = vector.multi_reduction <maximumf>, %19, %cst_17 [1] : vector<8x128xf32> to vector<8xf32>
      %26 = vector.shape_cast %25 : vector<8xf32> to vector<8x1xf32>
      %27 = vector.broadcast %26 : vector<8x1xf32> to vector<8x128xf32>
      %28 = arith.subf %19, %27 : vector<8x128xf32>
      %29 = math.exp %28 : vector<8x128xf32>
      %cst_18 = arith.constant dense<0.000000e+00> : vector<8xf32>
      %30 = vector.multi_reduction <add>, %29, %cst_18 [1] : vector<8x128xf32> to vector<8xf32>
      %31 = vector.shape_cast %30 : vector<8xf32> to vector<8x1xf32>
      %32 = math.log %31 : vector<8x1xf32>
      %33 = vector.broadcast %32 : vector<8x1xf32> to vector<8x128xf32>
      %34 = arith.subf %28, %33 : vector<8x128xf32>
      %35 = arith.mulf %24, %34 : vector<8x128xf32>
      %36 = vector.shape_cast %35 : vector<8x128xf32> to vector<1x8x128xf32>
      %cst_19 = arith.constant dense<0.000000e+00> : vector<1xf32>
      %37 = vector.multi_reduction <add>, %36, %cst_19 [1, 2] : vector<1x8x128xf32> to vector<1xf32>
      %38 = vector.shape_cast %37 : vector<1xf32> to vector<1x1x1xf32>
      %39 = vector.extract %38[0, 0, 0] : f32 from vector<1x1x1xf32>
      %cst_20 = arith.constant 0.000000e+00 : f32
      %40 = arith.subf %cst_20, %39 : f32
      %cst_21 = arith.constant 1.000000e+00 : f32
      %41 = vector.broadcast %cst_21 : f32 to vector<1x1xf32>
      %42 = vector.broadcast %40 : f32 to vector<1x1xf32>
      %43 = arith.mulf %42, %41 : vector<1x1xf32>
      %c0_22 = arith.constant 0 : index
      %c0_23 = arith.constant 0 : index
      %44 = vector.load %arg10[%c0_22, %c0_23] : memref<1x1xf32, #tpu.memory_space<vmem>>, vector<1x1xf32>
      tpu.vector_store %arg10[%c0_22, %c0_23], %43 {strides = array<i32>} : memref<1x1xf32, #tpu.memory_space<vmem>>, vector<1x1xf32>,
    } else {
    }
    %c0 = arith.constant 0 : index
    %c0_1 = arith.constant 0 : index
    %3 = vector.load %arg9[%c0, %c0_1] : memref<8x128xf32, #tpu.memory_space<vmem>>, vector<8x128xf32>
    %c0_2 = arith.constant 0 : index
    %c0_3 = arith.constant 0 : index
    %4 = vector.load %arg5[%c0_2, %c0_3] : memref<8x512xbf16, #tpu.memory_space<vmem>>, vector<8x512xbf16>
    %c0_4 = arith.constant 0 : index
    %c0_5 = arith.constant 0 : index
    %5 = vector.load %arg6[%c0_4, %c0_5] : memref<512x128xbf16, #tpu.memory_space<vmem>>, vector<512x128xbf16>
    %cst = arith.constant dense<0.000000e+00> : vector<8x128xf32>
    %6 = tpu.matmul %4, %5, %cst {dimension_numbers = #tpu.dot_dimension_numbers<[1], [0], [0], [1], [0, 0, 1, 1], [], []>} : vector<8x512xbf16>, vector<512x128xbf16>, vector<8x128xf32> -> vector<8x128xf32>
    %7 = arith.addf %3, %6 : vector<8x128xf32>
    %c0_6 = arith.constant 0 : index
    %c0_7 = arith.constant 0 : index
    %8 = vector.load %arg9[%c0_6, %c0_7] : memref<8x128xf32, #tpu.memory_space<vmem>>, vector<8x128xf32>
    tpu.vector_store %arg9[%c0_6, %c0_7], %7 {strides = array<i32>} : memref<8x128xf32, #tpu.memory_space<vmem>>, vector<8x128xf32>,
    %c1_i32 = arith.constant 1 : i32
    %9 = arith.cmpi eq, %arg1, %c1_i32 : i32
    %10 = arith.extui %9 : i1 to i32
    %c0_i32_8 = arith.constant 0 : i32
    %11 = arith.cmpi ne, %10, %c0_i32_8 : i32
    scf.if %11 {
      %12 = tpu.iota {dimensions = array<i32: 1>} : vector<8x128xi32>
      %c16_i32 = arith.constant 16 : i32
      %13 = vector.broadcast %c16_i32 : i32 to vector<8x128xi32>
      %14 = arith.cmpi slt, %12, %13 : vector<8x128xi32>
      %c0_9 = arith.constant 0 : index
      %c0_10 = arith.constant 0 : index
      %15 = vector.load %arg9[%c0_9, %c0_10] : memref<8x128xf32, #tpu.memory_space<vmem>>, vector<8x128xf32>
      %c0_11 = arith.constant 0 : index
      %c0_12 = arith.constant 0 : index
      %16 = vector.load %arg7[%c0_11, %c0_12] : memref<1x128xf32, #tpu.memory_space<vmem>>, vector<1x128xf32>
      %17 = vector.broadcast %16 : vector<1x128xf32> to vector<8x128xf32>
      %18 = arith.addf %15, %17 : vector<8x128xf32>
      %cst_13 = arith.constant -1.000000e+30 : f32
      %19 = vector.broadcast %cst_13 : f32 to vector<8x128xf32>
      %20 = arith.select %14, %18, %19 : vector<8x128xi1>, vector<8x128xf32>
      %c0_14 = arith.constant 0 : index
      %c0_15 = arith.constant 0 : index
      %21 = vector.load %arg4[%c0_14, %c0_15] : memref<8x128xf32, #tpu.memory_space<vmem>>, vector<8x128xf32>
      %cst_16 = arith.constant -1.000000e+30 : f32
      %22 = vector.broadcast %cst_16 : f32 to vector<8x128xf32>
      %23 = arith.select %14, %21, %22 : vector<8x128xi1>, vector<8x128xf32>
      %cst_17 = arith.constant 5.000000e-01 : f32
      %24 = vector.broadcast %cst_17 : f32 to vector<8x128xf32>
      %25 = arith.mulf %23, %24 : vector<8x128xf32>
      %cst_18 = arith.constant dense<0xFF800000> : vector<8xf32>
      %26 = vector.multi_reduction <maximumf>, %25, %cst_18 [1] : vector<8x128xf32> to vector<8xf32>
      %27 = vector.shape_cast %26 : vector<8xf32> to vector<8x1xf32>
      %28 = vector.broadcast %27 : vector<8x1xf32> to vector<8x128xf32>
      %29 = arith.subf %25, %28 : vector<8x128xf32>
      %30 = math.exp %29 : vector<8x128xf32>
      %cst_19 = arith.constant dense<0.000000e+00> : vector<8xf32>
      %31 = vector.multi_reduction <add>, %30, %cst_19 [1] : vector<8x128xf32> to vector<8xf32>
      %32 = vector.shape_cast %31 : vector<8xf32> to vector<8x1xf32>
      %33 = math.log %32 : vector<8x1xf32>
      %34 = vector.broadcast %33 : vector<8x1xf32> to vector<8x128xf32>
      %35 = arith.subf %29, %34 : vector<8x128xf32>
      %cst_20 = arith.constant 5.000000e-01 : f32
      %36 = vector.broadcast %cst_20 : f32 to vector<8x128xf32>
      %37 = arith.mulf %20, %36 : vector<8x128xf32>
      %cst_21 = arith.constant dense<0xFF800000> : vector<8xf32>
      %38 = vector.multi_reduction <maximumf>, %37, %cst_21 [1] : vector<8x128xf32> to vector<8xf32>
      %39 = vector.shape_cast %38 : vector<8xf32> to vector<8x1xf32>
      %40 = vector.broadcast %39 : vector<8x1xf32> to vector<8x128xf32>
      %41 = arith.subf %37, %40 : vector<8x128xf32>
      %42 = math.exp %41 : vector<8x128xf32>
      %cst_22 = arith.constant dense<0.000000e+00> : vector<8xf32>
      %43 = vector.multi_reduction <add>, %42, %cst_22 [1] : vector<8x128xf32> to vector<8xf32>
      %44 = vector.shape_cast %43 : vector<8xf32> to vector<8x1xf32>
      %45 = math.log %44 : vector<8x1xf32>
      %46 = vector.broadcast %45 : vector<8x1xf32> to vector<8x128xf32>
      %47 = arith.subf %41, %46 : vector<8x128xf32>
      %48 = math.exp %47 : vector<8x128xf32>
      %49 = arith.subf %47, %35 : vector<8x128xf32>
      %50 = arith.mulf %48, %49 : vector<8x128xf32>
      %51 = vector.shape_cast %50 : vector<8x128xf32> to vector<1x8x128xf32>
      %cst_23 = arith.constant dense<0.000000e+00> : vector<1xf32>
      %52 = vector.multi_reduction <add>, %51, %cst_23 [1, 2] : vector<1x8x128xf32> to vector<1xf32>
      %53 = vector.shape_cast %52 : vector<1xf32> to vector<1x1x1xf32>
      %54 = vector.extract %53[0, 0, 0] : f32 from vector<1x1x1xf32>
      %55 = tpu.iota {dimensions = array<i32: 2>} : vector<1x1x128xi32>
      %c0_24 = arith.constant 0 : index
      %c0_25 = arith.constant 0 : index
      %56 = vector.load %arg10[%c0_24, %c0_25] : memref<1x1xf32, #tpu.memory_space<vmem>>, vector<1x1xf32>
      %57 = vector.shape_cast %56 : vector<1x1xf32> to vector<1x1x1xf32>
      %c0_i32_26 = arith.constant 0 : i32
      %58 = vector.broadcast %c0_i32_26 : i32 to vector<1x1x128xi32>
      %59 = arith.cmpi eq, %55, %58 : vector<1x1x128xi32>
      %cst_27 = arith.constant 0.000000e+00 : f32
      %60 = vector.shape_cast %57 : vector<1x1x1xf32> to vector<1x1x1xf32>
      %61 = vector.broadcast %60 : vector<1x1x1xf32> to vector<1x1x128xf32>
      %62 = vector.broadcast %cst_27 : f32 to vector<1x1x128xf32>
      %63 = arith.select %59, %61, %62 : vector<1x1x128xi1>, vector<1x1x128xf32>
      %c1_i32_28 = arith.constant 1 : i32
      %64 = vector.broadcast %c1_i32_28 : i32 to vector<1x1x128xi32>
      %65 = arith.cmpi eq, %55, %64 : vector<1x1x128xi32>
      %cst_29 = arith.constant 0.000000e+00 : f32
      %66 = vector.broadcast %54 : f32 to vector<1x1x128xf32>
      %67 = vector.broadcast %cst_29 : f32 to vector<1x1x128xf32>
      %68 = arith.select %65, %66, %67 : vector<1x1x128xi1>, vector<1x1x128xf32>
      %69 = arith.addf %63, %68 : vector<1x1x128xf32>
      %c0_30 = arith.constant 0 : index
      %c0_31 = arith.constant 0 : index
      %c0_32 = arith.constant 0 : index
      %70 = vector.load %arg8[%c0_30, %c0_31, %c0_32] : memref<1x1x128xf32, #tpu.memory_space<vmem>>, vector<1x1x128xf32>
      tpu.vector_store %arg8[%c0_30, %c0_31, %c0_32], %69 {strides = array<i32>} : memref<1x1x128xf32, #tpu.memory_space<vmem>>, vector<1x1x128xf32>,
    } else {
    }
    return
  }
  func.func @transform_0(%arg0: i32, %arg1: i32) -> (i32, i32) {
    %c0_i32 = arith.constant 0 : i32
    %c0_i32_0 = arith.constant 0 : i32
    return %arg0, %c0_i32 : i32, i32
  }
  func.func @transform_1(%arg0: i32, %arg1: i32) -> (i32, i32) {
    %c0_i32 = arith.constant 0 : i32
    %c0_i32_0 = arith.constant 0 : i32
    return %arg0, %c0_i32 : i32, i32
  }
  func.func @transform_2(%arg0: i32, %arg1: i32) -> (i32, i32) {
    %c0_i32 = arith.constant 0 : i32
    %c0_i32_0 = arith.constant 0 : i32
    return %arg0, %c0_i32 : i32, i32
  }
  func.func @transform_3(%arg0: i32, %arg1: i32) -> (i32, i32) {
    %c0_i32 = arith.constant 0 : i32
    return %arg0, %arg1 : i32, i32
  }
  func.func @transform_4(%arg0: i32, %arg1: i32) -> (i32, i32) {
    %c0_i32 = arith.constant 0 : i32
    %c0_i32_0 = arith.constant 0 : i32
    return %arg1, %c0_i32 : i32, i32
  }
  func.func @transform_5(%arg0: i32, %arg1: i32) -> (i32, i32) {
    %c0_i32 = arith.constant 0 : i32
    %c0_i32_0 = arith.constant 0 : i32
    %c0_i32_1 = arith.constant 0 : i32
    return %c0_i32, %c0_i32_0 : i32, i32
  }
  func.func @transform_6(%arg0: i32, %arg1: i32) -> (i32, i32, i32) {
    %c0_i32 = arith.constant 0 : i32
    %c0_i32_0 = arith.constant 0 : i32
    %c0_i32_1 = arith.constant 0 : i32
    return %arg0, %c0_i32, %c0_i32_0 : i32, i32, i32
  }
}

</mosaic_0001>

<bundles_post_ra>
// kernel: tpu_custom_call.1
= control target key start
LH: loop header
LB: loop body
LE: loop exit
PB: predicated region body
PF: predicated region fallthrough
CT: control target
= control target key end

     0   :  { %11 = vsyncpa [#allocation5], 0  ;;  %s1641_s0 = inlined_call_operand.vmem [shape: s32[8,1], index: 0, kind: input, shape index: {}]   ;;  %s1642_s1 = inlined_call_operand.vmem [shape: f32[8,128], index: 1, kind: input, shape index: {}]   ;;  %s1643_s2 = inlined_call_operand.hbm [shape: f32[8,128], index: 2, kind: input, shape index: {}]   ;;  %s1644_s3 = inlined_call_operand.hbm [shape: bf16[8,1024], index: 3, kind: input, shape index: {}]   ;;  %s1645_s4 = inlined_call_operand.hbm [shape: bf16[1024,128], index: 4, kind: input, shape index: {}]   ;;  %s1646_s5 = inlined_call_operand.vmem [shape: f32[1,128], index: 5, kind: input, shape index: {}]   ;;  %s1647_s6 = inlined_call_operand.hbm [shape: f32[1,1,128], index: 6, kind: output, shape index: {}]  }
   0x1   :  { %12 = vsyncpa [#allocation8], 0 }
   0x2   :  { %14 = vsyncpa [#allocation8 + $0x1], 0 }
   0x3   :  { %15 = vsyncpa [#allocation6], 0  ;;  %s1457_s21 = smov 0   ;;  %s1459_s22 = smov 0  }
   0x4   :  { %s1461_s23 = smov 0   ;;  %s1463_s24 = smov 0  }
   0x5   :  { %s1465_s25 = smov 0   ;;  %s1467_s26 = smov 0  }
   0x6 LB: > { %s30_s27 = sadd.s32 1, %s1409_s25  ;;  %s120_s28 = sadd.s32 1, %s1401_s23  ;;  %s1413_s26 = sphi %s1467_s26, %s21_s26   ;;  %s1409_s25 = sphi %s1465_s25, %s1656_s25   ;;  %s1405_s24 = sphi %s1463_s24, %s1655_s24   ;;  %s1401_s23 = sphi %s1461_s23, %s1654_s23   ;;  %s1397_s22 = sphi %s1459_s22, %s1653_s22   ;;  %s1393_s21 = sphi %s1457_s21, %s1652_s21  }
   0x7   : > { %p31_p0 = scmp.ge.s32.totalorder %s30_s27, 2  ;;  %p127_p1 = scmp.ne.s32.totalorder %s1401_s23, %s1397_s22 }
   0x8   : > { %p128_p2 = scmp.eq.s32.totalorder %s1413_s26, 0  ;;  %p1159_p4 = scmp.lt.s32.totalorder %s1413_s26, 2 }
   0x9   : > { %s1658_s27 = smov (%p31_p0, %s30_s27), 0  ;;  %s261_s7 = sand.u32 1, %s1413_s26  }
   0xa   : > { %p1494_p3 = por %p128_p2, %p127_p1  ;;  %s116_s30 = ssub.s32 %s1409_s25, %s1658_s27 }
   0xb   : > { %p118_p5 = scmp.eq.s32.totalorder %s116_s30, 0  ;;  %s263_s8 = sand.u32 1, %s1401_s23  }
   0xc   : > { %s1097_s9 = sshll.u32 %s1409_s25, 4  ;;  %s952_s11 = sshll.u32 %s263_s8, 4 }
   0xd   : > { %s1505_s10 = scalar_select %p118_p5, %s1401_s23, %s120_s28  }
   0xe   : > { %s272_s14 = scalar_lea.hbm %s1644_s3, %s1097_s9  ;;  %s265_s16 = scalar_lea.vmem [#allocation7], %s952_s11 }
   0xf   : > { %s274_s15 = sshll.u32 %s272_s14, 4  ;;  %s276_s17 = sshll.u32 %s265_s16, 4  ;;  %s275_s15 = int_to_ptr.hbm [resolvable:$true] %s274_s15  ;;  %s277_s17 = int_to_ptr.vmem [resolvable:$true] %s276_s17 }
  0x10   : > { %p1514_p6 = pnand %p1159_p4, %p1494_p3  ;;  %s955_s19 = sshll.u32 %s263_s8, 8 }
  0x11   : > { %s1098_s20 = sshll.u32 %s1409_s25, 8  ;;  %s1519_s28 = scalar_lea.sflag [#allocation8], %s261_s7 }
  0x12   : > { %1154 = dma.hbm_to_vmem [thread:$0]  (!%p1514_p6), %s275_s15, 256, %s277_s17, %s1519_s28  }
  0x13   : > { %s287_s30 = scalar_lea.vmem [#allocation9], %s955_s19  ;;  %s1525_s11 = sadd.s32 4294967295, %s1413_s26  }
  0x14   : > { %s295_s9 = sshll.u32 %s287_s30, 4  ;;  %p133_p7 = scmp.ne.s32.totalorder %s1397_s22, %s1393_s21  ;;  %s296_s9 = int_to_ptr.vmem [resolvable:$true] %s295_s9 }
  0x15   : > { %p134_p8 = scmp.eq.s32.totalorder %s1525_s11, 0  ;;  %p947_p9 = scmp.ge.s32.totalorder %s1413_s26, 1 }
  0x16   : > { %p217_p10 = scmp.lt.s32.totalorder %s1413_s26, 3  ;;  %s245_s12 = sshll.u32 %s1643_s2, 4  ;;  %s246_s12 = int_to_ptr.hbm [resolvable:$true] %s245_s12 }
  0x17   : > { %p1534_p11 = por %p134_p8, %p133_p7  ;;  %s292_s15 = scalar_lea.hbm %s1645_s4, %s1098_s20 }
  0x18   : > { %p1541_p12 = pnand %p947_p9, %p217_p10  ;;  %s1415_s16 = smov [#allocation4]  }
  0x19   : > { %s247_s17 = sshll.u32 %s1415_s16, 4  ;;  %s293_s19 = sshll.u32 %s292_s15, 4  ;;  %s248_s17 = int_to_ptr.vmem [resolvable:$true] %s247_s17  ;;  %s294_s19 = int_to_ptr.hbm [resolvable:$true] %s293_s19 }
  0x1a   : > { %p1147_p13 = pneg %p1541_p12  ;;  %s1416_s30 = smov 64  }
  0x1b   : > { %s1417_s7 = smov 4   ;;  %307 = sbr.rel (%p1541_p12) target bundleno = 1128 (0x468), region = 44 }
  0x1c   : > { %p1148_p0 = pnand %p1147_p13, %p134_p8 }
  0x1d   : > { %1157 = dma.hbm_to_vmem [thread:$0]  (!%p1514_p6), %s294_s19, 4096, %s296_s9, %s1519_s28, %s1416_s30, %s1416_s30, %s1417_s7  }
  0x1e   : > { %1150 = dma.hbm_to_vmem [thread:$0]  (!%p1148_p0), %s246_s12, 128, %s248_s17, [#allocation5]  }
  0x20   : > { %1380 = dma.done.wait (%p134_p8), [#allocation5], 128  }
  0x21   : > { %1382 = vsyncadd (%p134_p8), [#allocation5], 4294967168  ;;  %s314_s20 = sand.u32 1, %s1525_s11   ;;  %s316_s8 = sand.u32 1, %s1397_s22  }
  0x22   : > { %s1563_s21 = sshll.u32 %s316_s8, 4  ;;  %s315_s12 = scalar_lea.sflag [#allocation8], %s314_s20 }
  0x23   : > { %s318_s18 = scalar_lea.vmem [#allocation7], %s1563_s21 }
  0x24   : > { %1384 = dma.done.wait (%p1534_p11), %s315_s12, 4352  }
  0x25   : > { %1386 = vsyncadd (%p1534_p11), %s315_s12, 4294962944  ;;  %s961_s28 = sshll.u32 %s316_s8, 8  ;;  %p962_p1 = scmp.ne.s32.totalorder %s1405_s24, 0 }
  0x26   : > { %s1570_s9 = scalar_lea.vmem [#allocation9], %s961_s28 }
  0x27   : > { %379 = sbr.rel (%p962_p1) target bundleno = 488 (0x1e8), region = 60 }
  0x2c   : > { %v381_v0 = vlaneseq  ;;  %v384_v2 = vld [vmem:[%s1642_s1] sm:$0xff]  ;;  %v1418_v5 = vmov 0   ;;  %v1419_v10 = vmov 0.0   ;;  %vm415_vm2 = vcmask 0  }
  0x2d   : > { %v386_v4 = vld [vmem:[%s1641_s0] sm:$0xff]  ;;  %1218 = vset.pattern.permute.xlu1 %v1418_v5  ;;  %1219 = vset.pattern.permute.xlu0 %v1418_v5  ;;  %380 = vst [vmem:[#allocation2] sm:$0xff] %v1419_v10 }
  0x2e   : > { %v382_v1 = vand.u32 127, %v381_v0  ;;  %388 = vperm.xlu1 %1218, %v386_v4  }
  0x30   : > { %vm383_vm0 = vcmp.lt.s32.totalorder %v382_v1, 16 }
  0x31   : > { %v385_v3 = vsel %vm383_vm0, %v384_v2, -1e+30 }
  0x32   : > { %393 = vmax.xlane.f32.xlu0 %v385_v3 }
  0xa0   : > { %v389_v12 = vpop.permute.xlu1 %388 }
  0xa1   : > { %vm390_vm1 = vcmp.eq.s32.totalorder %v382_v1, %v389_v12 }
  0xa2   : > { %v963_v15 = vsel %vm390_vm1, 1.0, %v1419_v10 }
  0xa5   : > { %v394_v6 = vpop.xlane.xlu0 %393 }
  0xa6   : > { %v395_v7 = vsub.f32 %v385_v3, %v394_v6 }
  0xa8   : > { %v396_v8 = vmul.f32 1.442695, %v395_v7 }
  0xaa   : > { %1220 = vpow2.f32 %v396_v8 }
  0xb0   : > { %v1221_v9 = vpop.eup %1220 }
  0xb1   : > { %398 = vadd.xlane.f32.xlu0 %v1221_v9 }
 0x124   : > { %v399_v11 = vpop.xlane.xlu0 %398 }
 0x125   : > { %1222 = vlog2.f32 %v399_v11 }
 0x12b   : > { %v1223_v13 = vpop.eup %1222 }
 0x12c   : > { %v401_v14 = vmul.f32 0.6931472, %v1223_v13 }
 0x12e   : > { %v402_v16 = vsub.f32 %v395_v7, %v401_v14 }
 0x130   : > { %v403_v17 = vmul.f32 %v963_v15, %v402_v16 }
 0x132   : > { %404 = vadd.xlane.f32.xlu1 %v403_v17 }
 0x1a5   : > { %v405_v18 = vpop.xlane.xlu1 %404 }
 0x1a6   : > { %v406_v19 = vrot.slane %v405_v18, 4 }
 0x1a8   : > { %v407_v20 = vadd.f32 %v406_v19, %v405_v18 }
 0x1aa   : > { %v408_v21 = vrot.slane %v407_v20, 2 }
 0x1ac   : > { %v409_v22 = vadd.f32 %v408_v21, %v407_v20 }
 0x1ae   : > { %v410_v23 = vrot.slane %v409_v22, 1 }
 0x1b0   : > { %v411_v24 = vadd.f32 %v410_v23, %v409_v22 }
 0x1b2   : > { %1131 = vpush %v411_v24 }
 0x1e3   : > { %s1132_s29 = spop %1131 }
 0x1e4   : > { %s413_s17 = ssub.f32 0.0, %s1132_s29 }
 0x1e6   : > { %v414_v25 = vstv %s413_s17 }
 0x1e7   : > { %416 = vst.msk [vmem:[#allocation3] sm:$0x1] %vm415_vm2, %v414_v25 }
 0x1e8 PF: > { %v1106_v26 = vld [vmem:[%s1570_s9 + $0x38] sm:$0xff]  ;;  %v1105_v30 = vld [vmem:[%s1570_s9 + $0x30] sm:$0xff]  ;;  %v1104_v34 = vld [vmem:[%s1570_s9 + $0x28] sm:$0xff]  ;;  %p1092_p2 = scmp.ne.s32.totalorder %s1405_s24, 1 }
 0x1e9   : > { %v1114_v27 = vld [vmem:[%s1570_s9 + $0x78] sm:$0xff]  ;;  %690 = vmatpush.bf16.msra.mxu0 %v1106_v26  ;;  %v1113_v31 = vld [vmem:[%s1570_s9 + $0x70] sm:$0xff]  ;;  %v1112_v35 = vld [vmem:[%s1570_s9 + $0x68] sm:$0xff] }
 0x1ea   : > { %v1122_v28 = vld [vmem:[%s1570_s9 + $0xb8] sm:$0xff]  ;;  %703 = vmatpush.bf16.msra.mxu1 %v1114_v27  ;;  %v1121_v32 = vld [vmem:[%s1570_s9 + $0xb0] sm:$0xff]  ;;  %v1120_v36 = vld [vmem:[%s1570_s9 + $0xa8] sm:$0xff] }
 0x1eb   : > { %v1130_v29 = vld [vmem:[%s1570_s9 + $0xf8] sm:$0xff]  ;;  %716 = vmatpush.bf16.msra.mxu2 %v1122_v28  ;;  %v1129_v33 = vld [vmem:[%s1570_s9 + $0xf0] sm:$0xff]  ;;  %v1128_v37 = vld [vmem:[%s1570_s9 + $0xe8] sm:$0xff] }
 0x1ec   : > { %729 = vmatpush.bf16.msra.mxu3 %v1130_v29  ;;  %v1103_v38 = vld [vmem:[%s1570_s9 + $0x20] sm:$0xff]  ;;  %v1102_v42 = vld [vmem:[%s1570_s9 + $0x18] sm:$0xff]  ;;  %v1101_v46 = vld [vmem:[%s1570_s9 + $0x10] sm:$0xff] }
 0x1ed   : > { %691 = vmatpush.bf16.msra.mxu0 %v1105_v30  ;;  %v1111_v39 = vld [vmem:[%s1570_s9 + $0x60] sm:$0xff]  ;;  %v1110_v43 = vld [vmem:[%s1570_s9 + $0x58] sm:$0xff]  ;;  %v1109_v47 = vld [vmem:[%s1570_s9 + $0x50] sm:$0xff] }
 0x1ee   : > { %704 = vmatpush.bf16.msra.mxu1 %v1113_v31  ;;  %v1119_v40 = vld [vmem:[%s1570_s9 + $0xa0] sm:$0xff]  ;;  %v1118_v44 = vld [vmem:[%s1570_s9 + $0x98] sm:$0xff]  ;;  %v1117_v48 = vld [vmem:[%s1570_s9 + $0x90] sm:$0xff] }
 0x1ef   : > { %717 = vmatpush.bf16.msra.mxu2 %v1121_v32  ;;  %v1127_v41 = vld [vmem:[%s1570_s9 + $0xe0] sm:$0xff]  ;;  %v1126_v45 = vld [vmem:[%s1570_s9 + $0xd8] sm:$0xff]  ;;  %v1125_v49 = vld [vmem:[%s1570_s9 + $0xd0] sm:$0xff] }
 0x1f0   : > { %730 = vmatpush.bf16.msra.mxu3 %v1129_v33  ;;  %v1100_v50 = vld [vmem:[%s1570_s9 + $0x8] sm:$0xff]  ;;  %v418_v52 = vld [vmem:[%s318_s18] sm:$0xff] }
 0x1f1   : > { %692 = vmatpush.bf16.msra.mxu0 %v1104_v34  ;;  %v1108_v51 = vld [vmem:[%s1570_s9 + $0x48] sm:$0xff]  ;;  %v486_v56 = vunpack.c.l.b16 %v418_v52  ;;  %v487_v57 = vunpack.c.h.b16 %v418_v52  ;;  %v1099_v58 = vld [vmem:[%s1570_s9] sm:$0xff] }
 0x1f2   : > { %705 = vmatpush.bf16.msra.mxu1 %v1112_v35  ;;  %v1116_v53 = vld [vmem:[%s1570_s9 + $0x88] sm:$0xff]  ;;  %v1107_v59 = vld [vmem:[%s1570_s9 + $0x40] sm:$0xff] }
 0x1f3   : > { %718 = vmatpush.bf16.msra.mxu2 %v1120_v36  ;;  %v1124_v54 = vld [vmem:[%s1570_s9 + $0xc8] sm:$0xff]  ;;  %v1115_v62 = vld [vmem:[%s1570_s9 + $0x80] sm:$0xff]  ;;  %v490_v0 = vpack.c.b16 %v486_v56, %v486_v56  ;;  %v491_v1 = vpack.c.b16 %v487_v57, %v487_v57 }
 0x1f4   : > { %731 = vmatpush.bf16.msra.mxu3 %v1128_v37  ;;  %v419_v55 = vld [vmem:[%s318_s18 + $0x8] sm:$0xff]  ;;  %v1123_v63 = vld [vmem:[%s1570_s9 + $0xc0] sm:$0xff] }
 0x1f5   : > { %693 = vmatpush.bf16.msra.mxu0 %v1103_v38  ;;  %v488_v60 = vunpack.c.l.b16 %v419_v55  ;;  %v489_v61 = vunpack.c.h.b16 %v419_v55  ;;  %v417_v12 = vld [vmem:[#allocation2] sm:$0xff] }
 0x1f6   : > { %706 = vmatpush.bf16.msra.mxu1 %v1111_v39 }
 0x1f7   : > { %719 = vmatpush.bf16.msra.mxu2 %v1119_v40  ;;  %v492_v2 = vpack.c.b16 %v488_v60, %v488_v60  ;;  %v493_v3 = vpack.c.b16 %v489_v61, %v489_v61 }
 0x1f8   : > { %732 = vmatpush.bf16.msra.mxu3 %v1127_v41 }
 0x1f9   : > { %694 = vmatpush.bf16.msra.mxu0 %v1102_v42 }
 0x1fa   : > { %707 = vmatpush.bf16.msra.mxu1 %v1110_v43 }
 0x1fb   : > { %720 = vmatpush.bf16.msra.mxu2 %v1118_v44 }
 0x1fc   : > { %733 = vmatpush.bf16.msra.mxu3 %v1126_v45 }
 0x1fd   : > { %695 = vmatpush.bf16.msra.mxu0 %v1101_v46 }
 0x1fe   : > { %708 = vmatpush.bf16.msra.mxu1 %v1109_v47 }
 0x1ff   : > { %721 = vmatpush.bf16.msra.mxu2 %v1117_v48 }
 0x200   : > { %734 = vmatpush.bf16.msra.mxu3 %v1125_v49 }
 0x201   : > { %696 = vmatpush.bf16.msra.mxu0 %v1100_v50 }
 0x202   : > { %709 = vmatpush.bf16.msra.mxu1 %v1108_v51 }
 0x203   : > { %722 = vmatpush.bf16.msra.mxu2 %v1116_v53 }
 0x204   : > { %735 = vmatpush.bf16.msra.mxu3 %v1124_v54 }
 0x205   : > { %697 = vmatpush.bf16.msra.mxu0 %v1099_v58 }
 0x206   : > { %710 = vmatpush.bf16.msra.mxu1 %v1107_v59 }
 0x207   : > { %723 = vmatpush.bf16.msra.mxu2 %v1115_v62 }
 0x208   : > { %736 = vmatpush.bf16.msra.mxu3 %v1123_v63  ;;  %698 = vmatmul.bf16.vlgmr.msra.gmra.mxu0 %v490_v0 }
 0x209   : > { %711 = vmatmul.bf16.vlgmr.msra.gmra.mxu1 %v491_v1 }
 0x20a   : > { %724 = vmatmul.bf16.vlgmr.msra.gmra.mxu2 %v492_v2 }
 0x20b   : > { %737 = vmatmul.bf16.vlgmr.msra.gmra.mxu3 %v493_v3 }
 0x285   : > { %v699_v4 = vpop.f32.mrf.mxu0 }
 0x286   : > { %v712_v5 = vpop.f32.mrf.mxu1 }
 0x287   : > { %v713_v6 = vadd.f32 %v712_v5, %v699_v4 }
 0x28d   : > { %v725_v7 = vpop.f32.mrf.mxu2  ;;  %v701_v10 = vpop.f32.mrf.mxu0 }
 0x28e   : > { %v738_v8 = vpop.f32.mrf.mxu3  ;;  %v726_v9 = vadd.f32 %v725_v7, %v713_v6  ;;  %v714_v11 = vpop.f32.mrf.mxu1 }
 0x290   : > { %v739_v13 = vadd.f32 %v738_v8, %v726_v9 }
 0x292   : > { %v742_v14 = vadd.f32 %v739_v13, %v417_v12  ;;  %747 = sbr.rel (%p1092_p2) target bundleno = 1122 (0x462), region = 64 }
 0x294   : > { %743 = vst [vmem:[#allocation2] sm:$0xff] %v742_v14 }
 0x295   : > { %v727_v15 = vpop.f32.mrf.mxu2 }
 0x296   : > { %v740_v16 = vpop.f32.mrf.mxu3 }
 0x297   : > { %v748_v17 = vlaneseq  ;;  %v1226_v19 = vld [vmem:[%s1646_s5] ss:$0 sm:$0xff]  ;;  %v758_v24 = vld [vmem:[#allocation4] sm:$0xff]  ;;  %v1420_v35 = vmov 0   ;;  %v795_v48 = vld [vmem:[#allocation3] sm:$0x1] }
 0x298   : > { %1224 = vset.pattern.permute.xlu2 %v1420_v35  ;;  %1225 = vset.pattern.permute.xlu0 %v1420_v35 }
 0x299   : > { %v749_v20 = vand.u32 127, %v748_v17 }
 0x29b   : > { %v751_v18 = vld [vmem:[#allocation2] sm:$0xff]  ;;  %vm750_vm3 = vcmp.lt.s32.totalorder %v749_v20, 16  ;;  %vm796_vm4 = vcmp.eq.s32.totalorder %v749_v20, 0  ;;  %vm804_vm5 = vcmp.eq.s32.totalorder %v749_v20, 1 }
 0x29c   : > { %v756_v21 = vadd.f32 %v1226_v19, %v751_v18  ;;  %v759_v25 = vsel %vm750_vm3, %v758_v24, -1e+30 }
 0x29d   : > { %v760_v26 = vmul.f32 0.5, %v759_v25 }
 0x29e   : > { %v757_v22 = vsel %vm750_vm3, %v756_v21, -1e+30 }
 0x29f   : > { %v771_v23 = vmul.f32 0.5, %v757_v22 }
 0x2a1   : > { %772 = vmax.xlane.f32.xlu0 %v771_v23 }
 0x2a9   : > { %761 = vmax.xlane.f32.xlu0 %v760_v26 }
 0x314   : > { %v773_v27 = vpop.xlane.xlu0 %772 }
 0x315   : > { %v774_v28 = vsub.f32 %v771_v23, %v773_v27 }
 0x317   : > { %v775_v29 = vmul.f32 1.442695, %v774_v28 }
 0x319   : > { %1227 = vpow2.f32 %v775_v29 }
 0x31c   : > { %v762_v30 = vpop.xlane.xlu0 %761 }
 0x31d   : > { %v763_v31 = vsub.f32 %v760_v26, %v762_v30 }
 0x31f   : > { %v1228_v32 = vpop.eup %1227  ;;  %v764_v33 = vmul.f32 1.442695, %v763_v31 }
 0x320   : > { %777 = vadd.xlane.f32.xlu1 %v1228_v32 }
 0x321   : > { %1229 = vpow2.f32 %v764_v33 }
 0x327   : > { %v1230_v34 = vpop.eup %1229 }
 0x328   : > { %766 = vadd.xlane.f32.xlu1 %v1230_v34 }
 0x393   : > { %v778_v36 = vpop.xlane.xlu1 %777 }
 0x394   : > { %1231 = vlog2.f32 %v778_v36 }
 0x39a   : > { %v1232_v37 = vpop.eup %1231 }
 0x39b   : > { %v780_v38 = vmul.f32 0.6931472, %v1232_v37  ;;  %v767_v39 = vpop.xlane.xlu1 %766 }
 0x39c   : > { %1233 = vlog2.f32 %v767_v39 }
 0x39d   : > { %v781_v40 = vsub.f32 %v774_v28, %v780_v38 }
 0x39f   : > { %v782_v41 = vmul.f32 1.442695, %v781_v40 }
 0x3a1   : > { %1235 = vpow2.f32 %v782_v41 }
 0x3a2   : > { %v1234_v42 = vpop.eup %1233 }
 0x3a3   : > { %v769_v43 = vmul.f32 0.6931472, %v1234_v42 }
 0x3a5   : > { %v770_v44 = vsub.f32 %v763_v31, %v769_v43 }
 0x3a7   : > { %v1236_v45 = vpop.eup %1235  ;;  %v784_v46 = vsub.f32 %v781_v40, %v770_v44 }
 0x3a9   : > { %v785_v47 = vmul.f32 %v1236_v45, %v784_v46 }
 0x3ab   : > { %786 = vadd.xlane.f32.xlu2 %v785_v47 }
 0x3c3   : > { %799 = vperm.xlu2 %1224, %v795_v48  }
 0x41e   : > { %v787_v49 = vpop.xlane.xlu2 %786 }
 0x41f   : > { %v788_v50 = vrot.slane %v787_v49, 4 }
 0x421   : > { %v789_v51 = vadd.f32 %v788_v50, %v787_v49 }
 0x423   : > { %v790_v52 = vrot.slane %v789_v51, 2 }
 0x425   : > { %v791_v53 = vadd.f32 %v790_v52, %v789_v51 }
 0x426   : > { %v800_v56 = vpop.permute.xlu2 %799 }
 0x427   : > { %v792_v54 = vrot.slane %v791_v53, 1  ;;  %v802_v57 = vperm.slane %v800_v56, 0 }
 0x429   : > { %v793_v55 = vadd.f32 %v792_v54, %v791_v53  ;;  %v803_v58 = vsel %vm796_vm4, %v802_v57, 0.0 }
 0x42b   : > { %1133 = vpush %v793_v55 }
 0x45c   : > { %s1134_s24 = spop %1133 }
 0x45d   : > { %v805_v59 = vstv %s1134_s24 }
 0x45e   : > { %v806_v60 = vsel %vm804_vm5, %v805_v59, 0.0 }
 0x45f   : > { %v807_v61 = vadd.f32 %v806_v60, %v803_v58 }
 0x461   : > { %808 = vst [vmem:[#allocation10] sm:$0x1] %v807_v61 }
 0x462 PF: > { %p1161_p3 = scmp.eq.s32.totalorder %s1525_s11, 1  ;;  %s818_s8 = sshll.u32 %s1647_s6, 4  ;;  %s819_s8 = int_to_ptr.hbm [resolvable:$true] %s818_s8 }
 0x463   : > { %s1421_s21 = smov [#allocation10]  }
 0x464   : > { %s816_s12 = sshll.u32 %s1421_s21, 4  ;;  %s817_s12 = int_to_ptr.vmem [resolvable:$true] %s816_s12 }
 0x465   : > { %1144 = dma.vmem_to_hbm [thread:$0]  (%p1161_p3), %s817_s12, 16, %s819_s8, [#allocation6]  }
 0x466   : > { %1388 = dma.done.wait (%p1161_p3), [#allocation6], 16  }
 0x467   : > { %1390 = vsyncadd (%p1161_p3), [#allocation6], 4294967280 }
 0x468 PF: > { %s21_s26 = sadd.s32 1, %s1413_s26   ;;  %s1652_s21 = smov %s1397_s22 }
 0x469   : > { %p18_p4 = scmp.ge.s32.totalorder %s21_s26, 4   ;;  %s1653_s22 = smov %s1401_s23 }
 0x46a   : > { %s1654_s23 = smov %s1505_s10  ;;  %s1655_s24 = smov %s1409_s25 }
 0x46b   : > { %s1656_s25 = smov %s1658_s27  ;;  %20 = sbr.rel (!%p18_p4) target bundleno = 6 (0x6), region = 113 }
 0x470   :  { %832 = vsyncpa [#allocation5], 1 }
 0x471   :  { %834 = vsyncpa [#allocation5 + $0x1], 1 }
 0x472   :  { %835 = vsyncpa [#allocation8], 1 }
 0x473   :  { %837 = vsyncpa [#allocation8 + $0x1], 1 }
 0x474   :  { %838 = vsyncpa [#allocation6], 1 }
 0x475   :  { %840 = vsyncpa [#allocation6 + $0x1], 1 }

</bundles_post_ra>
